<compile_context>
chip_gen: v5e
topology: v5e:2x2
jax: 0.10.0
libtpu: 0.0.40
codegen_flags: <defaults>
</compile_context>

<pallas_src>
import jax
import jax.numpy as jnp
from jax.experimental import pallas as pl
from jax.experimental.pallas import tpu as pltpu

FEATURE_DIM = 512
HIDDEN = 32
NODES = 2


def domain_predictor_kernel(x_ref, w1_ref, b1_ref, w2_ref, b2_ref, o_ref):
    # x tile: [TB, 512] in caller's dtype (bf16 recommended); weights resident.
    x = x_ref[...]                                                        # [TB, 512]

    # d_fc2: Linear(512 -> 32); MXU accumulates in f32 regardless of input dtype.
    h = jnp.dot(x, w1_ref[...], preferred_element_type=jnp.float32)      # [TB, 32]
    h = h + b1_ref[...]                                                   # bias broadcast [1,32]

    # d_relu2
    h = jnp.maximum(h, 0.0)

    # r_dropout: Dropout3d(p=0.2) — identity in eval/inference mode.

    # d_fc3: Linear(32 -> nodes), f32 all the way (tiny).
    logits = jnp.dot(h, w2_ref[...], preferred_element_type=jnp.float32)  # [TB, NODES]
    logits = logits + b2_ref[...]

    # d_pred: Softmax(dim=1) over the last axis (numerically stable).
    m = jnp.max(logits, axis=-1, keepdims=True)
    e = jnp.exp(logits - m)
    denom = jnp.sum(e, axis=-1, keepdims=True)
    o_ref[...] = (e * pl.reciprocal(denom, approx=True)).astype(o_ref.dtype)


def _round_up(x, m):
    return ((x + m - 1) // m) * m


def domain_predictor(x, w1, b1, w2, b2, *, batch_tile=1024):
    B, F = x.shape
    H = w1.shape[1]
    N = w2.shape[1]
    assert w1.shape == (F, H) and b1.shape == (1, H)
    assert w2.shape == (H, N) and b2.shape == (1, N)

    # Batch tile: multiple of 8 (sublane), capped so double-buffered x tiles stay
    # tiny even under v5e's 16 MiB scoped-VMEM default.
    TB = min(_round_up(batch_tile, 8), _round_up(B, 8))
    grid = (pl.cdiv(B, TB),)

    bytes_x = x.size * x.dtype.itemsize
    bytes_w = (w1.size * w1.dtype.itemsize + b1.size * b1.dtype.itemsize
               + w2.size * w2.dtype.itemsize + b2.size * b2.dtype.itemsize)
    cost = pl.CostEstimate(
        flops=2 * B * F * H + 2 * B * H * N,
        transcendentals=B * N,                       # exp in the softmax
        bytes_accessed=bytes_x + bytes_w + B * N * 4,
    )

    return pl.pallas_call(
        domain_predictor_kernel,
        out_shape=jax.ShapeDtypeStruct((B, N), jnp.float32),
        grid=grid,
        in_specs=[
            pl.BlockSpec((TB, F), lambda i: (i, 0)),   # x tiled over batch (pipelined)
            pl.BlockSpec((F, H), lambda i: (0, 0)),    # weights resident across grid
            pl.BlockSpec((1, H), lambda i: (0, 0)),
            pl.BlockSpec((H, N), lambda i: (0, 0)),
            pl.BlockSpec((1, N), lambda i: (0, 0)),
        ],
        out_specs=pl.BlockSpec((TB, N), lambda i: (i, 0)),
        compiler_params=pltpu.CompilerParams(
            dimension_semantics=("parallel",),         # batch rows are independent
            vmem_limit_bytes=32 * 1024 * 1024,
        ),
        cost_estimate=cost,
    )(x, w1, b1, w2, b2)


def init_params(key):
    # Deterministic init mimicking nn.Linear default: U(-1/sqrt(fan_in), 1/sqrt(fan_in)).
    k1, k2, k3, k4 = jax.random.split(key, 4)
    bound1 = 1.0 / (FEATURE_DIM ** 0.5)
    bound2 = 1.0 / (HIDDEN ** 0.5)
    w1 = jax.random.uniform(k1, (FEATURE_DIM, HIDDEN), jnp.float32, -bound1, bound1)
    b1 = jax.random.uniform(k2, (1, HIDDEN), jnp.float32, -bound1, bound1)
    w2 = jax.random.uniform(k3, (HIDDEN, NODES), jnp.float32, -bound2, bound2)
    b2 = jax.random.uniform(k4, (1, NODES), jnp.float32, -bound2, bound2)
    return w1, b1, w2, b2


def reference(x, w1, b1, w2, b2):
    h = jnp.maximum(x @ w1 + b1, 0.0)
    logits = h @ w2 + b2
    return jax.nn.softmax(logits, axis=1)


if __name__ == "__main__":
    key = jax.random.PRNGKey(0)
    kx, kp = jax.random.split(key)
    batch = 2
    x_f32 = jax.random.normal(kx, (batch, FEATURE_DIM), jnp.float32)
    w1, b1, w2, b2 = init_params(kp)

    # Producer-side bf16 cast for the bandwidth-bound operands (x, w1); the MXU
    # accumulates in f32 inside the kernel.
    x_bf16 = x_f32.astype(jnp.bfloat16)
    w1_bf16 = w1.astype(jnp.bfloat16)

    out = domain_predictor(x_bf16, w1_bf16, b1, w2, b2)
    out = jax.block_until_ready(out)

    ref = reference(x_f32, w1, b1, w2, b2)
    assert out.shape == (batch, NODES)
    # bf16 input rounding on the 512-wide matmul -> loosened tolerance vs f32 reference.
    assert jnp.allclose(out, ref, atol=2e-2, rtol=2e-2), "mismatch vs reference"
    assert jnp.allclose(jnp.sum(out, axis=1), 1.0, atol=1e-2), "softmax rows must sum to 1"

    print("KERNEL_OK")
</pallas_src>

<mosaic_0001>
module attributes {stable_mosaic.version = 11 : i64} {
  func.func @domain_predictor_kernel(%arg0: i32, %arg1: memref<8x512xbf16, #tpu.memory_space<vmem>>, %arg2: memref<512x32xbf16, #tpu.memory_space<vmem>>, %arg3: memref<1x32xf32, #tpu.memory_space<vmem>>, %arg4: memref<32x2xf32, #tpu.memory_space<vmem>>, %arg5: memref<1x2xf32, #tpu.memory_space<vmem>>, %arg6: memref<8x2xf32, #tpu.memory_space<vmem>>) attributes {dimension_semantics = [#tpu.dimension_semantics<parallel>], iteration_bounds = array<i64: 1>, scalar_prefetch = 0 : i64, scratch_operands = 0 : i64, tpu.core_type = #tpu.core_type<tc>, window_params = [{transform_indices = @transform_0, window_bounds = array<i64: 8, 512>}, {pipeline_mode = #tpu.pipeline_mode<synchronous>, transform_indices = @transform_1, window_bounds = array<i64: 512, 32>}, {pipeline_mode = #tpu.pipeline_mode<synchronous>, transform_indices = @transform_2, window_bounds = array<i64: 1, 32>}, {pipeline_mode = #tpu.pipeline_mode<synchronous>, transform_indices = @transform_3, window_bounds = array<i64: 32, 2>}, {pipeline_mode = #tpu.pipeline_mode<synchronous>, transform_indices = @transform_4, window_bounds = array<i64: 1, 2>}, {transform_indices = @transform_5, window_bounds = array<i64: 8, 2>}]} {
    %c0 = arith.constant 0 : index
    %c0_0 = arith.constant 0 : index
    %0 = vector.load %arg1[%c0, %c0_0] : memref<8x512xbf16, #tpu.memory_space<vmem>>, vector<8x512xbf16>
    %c0_1 = arith.constant 0 : index
    %c0_2 = arith.constant 0 : index
    %1 = vector.load %arg2[%c0_1, %c0_2] : memref<512x32xbf16, #tpu.memory_space<vmem>>, vector<512x32xbf16>
    %cst = arith.constant dense<0.000000e+00> : vector<8x32xf32>
    %2 = tpu.matmul %0, %1, %cst {dimension_numbers = #tpu.dot_dimension_numbers<[1], [0], [0], [1], [0, 0, 1, 1], [], []>} : vector<8x512xbf16>, vector<512x32xbf16>, vector<8x32xf32> -> vector<8x32xf32>
    %c0_3 = arith.constant 0 : index
    %c0_4 = arith.constant 0 : index
    %3 = vector.load %arg3[%c0_3, %c0_4] : memref<1x32xf32, #tpu.memory_space<vmem>>, vector<1x32xf32>
    %4 = vector.broadcast %3 : vector<1x32xf32> to vector<8x32xf32>
    %5 = arith.addf %2, %4 : vector<8x32xf32>
    %cst_5 = arith.constant 0.000000e+00 : f32
    %6 = vector.broadcast %cst_5 : f32 to vector<8x32xf32>
    %7 = arith.maximumf %5, %6 : vector<8x32xf32>
    %c0_6 = arith.constant 0 : index
    %c0_7 = arith.constant 0 : index
    %8 = vector.load %arg4[%c0_6, %c0_7] : memref<32x2xf32, #tpu.memory_space<vmem>>, vector<32x2xf32>
    %cst_8 = arith.constant dense<0.000000e+00> : vector<8x2xf32>
    %9 = tpu.matmul %7, %8, %cst_8 {dimension_numbers = #tpu.dot_dimension_numbers<[1], [0], [0], [1], [0, 0, 1, 1], [], []>} : vector<8x32xf32>, vector<32x2xf32>, vector<8x2xf32> -> vector<8x2xf32>
    %c0_9 = arith.constant 0 : index
    %c0_10 = arith.constant 0 : index
    %10 = vector.load %arg5[%c0_9, %c0_10] : memref<1x2xf32, #tpu.memory_space<vmem>>, vector<1x2xf32>
    %11 = vector.broadcast %10 : vector<1x2xf32> to vector<8x2xf32>
    %12 = arith.addf %9, %11 : vector<8x2xf32>
    %cst_11 = arith.constant dense<0xFF800000> : vector<8xf32>
    %13 = vector.multi_reduction <maximumf>, %12, %cst_11 [1] : vector<8x2xf32> to vector<8xf32>
    %14 = vector.shape_cast %13 : vector<8xf32> to vector<8x1xf32>
    %15 = vector.broadcast %14 : vector<8x1xf32> to vector<8x2xf32>
    %16 = arith.subf %12, %15 : vector<8x2xf32>
    %17 = math.exp %16 : vector<8x2xf32>
    %cst_12 = arith.constant dense<0.000000e+00> : vector<8xf32>
    %18 = vector.multi_reduction <add>, %17, %cst_12 [1] : vector<8x2xf32> to vector<8xf32>
    %19 = vector.shape_cast %18 : vector<8xf32> to vector<8x1xf32>
    %20 = tpu.reciprocal %19 {approx = true} : vector<8x1xf32> -> vector<8x1xf32>
    %21 = vector.broadcast %20 : vector<8x1xf32> to vector<8x2xf32>
    %22 = arith.mulf %17, %21 : vector<8x2xf32>
    %c0_13 = arith.constant 0 : index
    %c0_14 = arith.constant 0 : index
    %23 = vector.load %arg6[%c0_13, %c0_14] : memref<8x2xf32, #tpu.memory_space<vmem>>, vector<8x2xf32>
    tpu.vector_store %arg6[%c0_13, %c0_14], %22 {strides = array<i32>} : memref<8x2xf32, #tpu.memory_space<vmem>>, vector<8x2xf32>,
    return
  }
  func.func @transform_0(%arg0: i32) -> (i32, i32) {
    %c0_i32 = arith.constant 0 : i32
    %c0_i32_0 = arith.constant 0 : i32
    return %arg0, %c0_i32 : i32, i32
  }
  func.func @transform_1(%arg0: i32) -> (i32, i32) {
    %c0_i32 = arith.constant 0 : i32
    %c0_i32_0 = arith.constant 0 : i32
    %c0_i32_1 = arith.constant 0 : i32
    return %c0_i32, %c0_i32_0 : i32, i32
  }
  func.func @transform_2(%arg0: i32) -> (i32, i32) {
    %c0_i32 = arith.constant 0 : i32
    %c0_i32_0 = arith.constant 0 : i32
    %c0_i32_1 = arith.constant 0 : i32
    return %c0_i32, %c0_i32_0 : i32, i32
  }
  func.func @transform_3(%arg0: i32) -> (i32, i32) {
    %c0_i32 = arith.constant 0 : i32
    %c0_i32_0 = arith.constant 0 : i32
    %c0_i32_1 = arith.constant 0 : i32
    return %c0_i32, %c0_i32_0 : i32, i32
  }
  func.func @transform_4(%arg0: i32) -> (i32, i32) {
    %c0_i32 = arith.constant 0 : i32
    %c0_i32_0 = arith.constant 0 : i32
    %c0_i32_1 = arith.constant 0 : i32
    return %c0_i32, %c0_i32_0 : i32, i32
  }
  func.func @transform_5(%arg0: i32) -> (i32, i32) {
    %c0_i32 = arith.constant 0 : i32
    %c0_i32_0 = arith.constant 0 : i32
    return %arg0, %c0_i32 : i32, i32
  }
}

</mosaic_0001>

<bundles_post_ra>
// kernel: tpu_custom_call.1
= control target key start
LH: loop header
LB: loop body
LE: loop exit
PB: predicated region body
PF: predicated region fallthrough
CT: control target
= control target key end

     0   :  { %10 = vsyncpa [#allocation3], 0  ;;  %vm365_vm0 = vcmask 261120   ;;  %vm389_vm1 = vcmask 15360   ;;  %s778_s0 = inlined_call_operand.vmem [shape: bf16[2,512], index: 0, kind: input, shape index: {}]   ;;  %s779_s1 = inlined_call_operand.vmem [shape: bf16[512,32], index: 1, kind: input, shape index: {}]   ;;  %s780_s2 = inlined_call_operand.vmem [shape: f32[1,32], index: 2, kind: input, shape index: {}]   ;;  %s781_s3 = inlined_call_operand.vmem [shape: f32[32,2], index: 3, kind: input, shape index: {}]   ;;  %s782_s4 = inlined_call_operand.vmem [shape: f32[1,2], index: 4, kind: input, shape index: {}]   ;;  %s783_s5 = inlined_call_operand.hbm [shape: f32[2,2], index: 5, kind: output, shape index: {}]  }
   0x1   :  { %v556_v0 = vld [vmem:[%s779_s1 + $0x38] sm:$0xff]  ;;  %v555_v4 = vld [vmem:[%s779_s1 + $0x30] sm:$0xff]  ;;  %v554_v8 = vld [vmem:[%s779_s1 + $0x28] sm:$0xff] }
   0x2   :  { %v564_v1 = vld [vmem:[%s779_s1 + $0x78] sm:$0xff]  ;;  %304 = vmatpush.bf16.msra.mxu0 %v556_v0  ;;  %v563_v5 = vld [vmem:[%s779_s1 + $0x70] sm:$0xff]  ;;  %v562_v9 = vld [vmem:[%s779_s1 + $0x68] sm:$0xff] }
   0x3   :  { %v572_v2 = vld [vmem:[%s779_s1 + $0xb8] sm:$0xff]  ;;  %317 = vmatpush.bf16.msra.mxu1 %v564_v1  ;;  %v571_v6 = vld [vmem:[%s779_s1 + $0xb0] sm:$0xff]  ;;  %v570_v10 = vld [vmem:[%s779_s1 + $0xa8] sm:$0xff] }
   0x4   :  { %v580_v3 = vld [vmem:[%s779_s1 + $0xf8] sm:$0xff]  ;;  %330 = vmatpush.bf16.msra.mxu2 %v572_v2  ;;  %v579_v7 = vld [vmem:[%s779_s1 + $0xf0] sm:$0xff]  ;;  %v578_v11 = vld [vmem:[%s779_s1 + $0xe8] sm:$0xff] }
   0x5   :  { %343 = vmatpush.bf16.msra.mxu3 %v580_v3  ;;  %v553_v12 = vld [vmem:[%s779_s1 + $0x20] sm:$0xff]  ;;  %v23_v18 = vld [vmem:[%s778_s0 + $0x8] sm:$0xf]  ;;  %v24_v19 = vld [vmem:[%s778_s0 + $0xc] sm:$0xf] }
   0x6   :  { %305 = vmatpush.bf16.msra.mxu0 %v555_v4  ;;  %v561_v13 = vld [vmem:[%s779_s1 + $0x60] sm:$0xff]  ;;  %v552_v20 = vld [vmem:[%s779_s1 + $0x18] sm:$0xff]  ;;  %100 = vst [vmem:[#allocation1 + $0x2] ss:$9 sm:$0xff] %v23_v18  ;;  %v551_v24 = vld [vmem:[%s779_s1 + $0x10] sm:$0xff] }
   0x7   :  { %318 = vmatpush.bf16.msra.mxu1 %v563_v5  ;;  %v569_v14 = vld [vmem:[%s779_s1 + $0xa0] sm:$0xff]  ;;  %v560_v21 = vld [vmem:[%s779_s1 + $0x58] sm:$0xff]  ;;  %103 = vst [vmem:[#allocation1 + $0x3] ss:$9 sm:$0xff] %v24_v19  ;;  %v559_v25 = vld [vmem:[%s779_s1 + $0x50] sm:$0xff] }
   0x8   :  { %331 = vmatpush.bf16.msra.mxu2 %v571_v6  ;;  %v577_v15 = vld [vmem:[%s779_s1 + $0xe0] sm:$0xff]  ;;  %v568_v22 = vld [vmem:[%s779_s1 + $0x98] sm:$0xff]  ;;  %v567_v26 = vld [vmem:[%s779_s1 + $0x90] sm:$0xff] }
   0x9   :  { %344 = vmatpush.bf16.msra.mxu3 %v579_v7  ;;  %v21_v16 = vld [vmem:[%s778_s0] sm:$0xf]  ;;  %v22_v17 = vld [vmem:[%s778_s0 + $0x4] sm:$0xf]  ;;  %v576_v23 = vld [vmem:[%s779_s1 + $0xd8] sm:$0xff] }
   0xa   :  { %306 = vmatpush.bf16.msra.mxu0 %v554_v8  ;;  %94 = vst [vmem:[#allocation1] ss:$9 sm:$0xff] %v21_v16  ;;  %v575_v27 = vld [vmem:[%s779_s1 + $0xd0] sm:$0xff]  ;;  %v550_v28 = vld [vmem:[%s779_s1 + $0x8] sm:$0xff]  ;;  %v549_v32 = vld [vmem:[%s779_s1] sm:$0xff] }
   0xb   :  { %319 = vmatpush.bf16.msra.mxu1 %v562_v9  ;;  %97 = vst [vmem:[#allocation1 + $0x1] ss:$9 sm:$0xff] %v22_v17  ;;  %v558_v29 = vld [vmem:[%s779_s1 + $0x48] sm:$0xff]  ;;  %v557_v33 = vld [vmem:[%s779_s1 + $0x40] sm:$0xff]  ;;  %v360_v36 = vld [vmem:[%s781_s3 + $0x18] sm:$0xff] }
   0xc   :  { %332 = vmatpush.bf16.msra.mxu2 %v570_v10  ;;  %v566_v30 = vld [vmem:[%s779_s1 + $0x88] sm:$0xff]  ;;  %v565_v34 = vld [vmem:[%s779_s1 + $0x80] sm:$0xff]  ;;  %v359_v41 = vld [vmem:[%s781_s3 + $0x10] sm:$0xff] }
   0xd   :  { %345 = vmatpush.bf16.msra.mxu3 %v578_v11  ;;  %v574_v31 = vld [vmem:[%s779_s1 + $0xc8] sm:$0xff]  ;;  %v573_v35 = vld [vmem:[%s779_s1 + $0xc0] sm:$0xff] }
   0xe   :  { %307 = vmatpush.bf16.msra.mxu0 %v553_v12  ;;  %v358_v42 = vld [vmem:[%s781_s3 + $0x8] sm:$0xff]  ;;  %v357_v43 = vld [vmem:[%s781_s3] sm:$0xff] }
   0xf   :  { %320 = vmatpush.bf16.msra.mxu1 %v561_v13  ;;  %v584_v44 = vld [vmem:[%s780_s2] ss:$0 sm:$0xff] }
  0x10   :  { %333 = vmatpush.bf16.msra.mxu2 %v569_v14  ;;  %v585_v58 = vld [vmem:[%s782_s4] ss:$0 sm:$0xff] }
  0x11   :  { %346 = vmatpush.bf16.msra.mxu3 %v577_v15 }
  0x12   :  { %308 = vmatpush.bf16.msra.mxu0 %v552_v20  ;;  %v104_v37 = vld [vmem:[#allocation1] sm:$0xff]  ;;  %v105_v38 = vld [vmem:[#allocation1 + $0x9] sm:$0xff]  ;;  %v106_v39 = vld [vmem:[#allocation1 + $0x12] sm:$0xff] }
  0x13   :  { %321 = vmatpush.bf16.msra.mxu1 %v560_v21  ;;  %v107_v40 = vld [vmem:[#allocation1 + $0x1b] sm:$0xff] }
  0x14   :  { %334 = vmatpush.bf16.msra.mxu2 %v568_v22 }
  0x15   :  { %347 = vmatpush.bf16.msra.mxu3 %v576_v23 }
  0x16   :  { %309 = vmatpush.bf16.msra.mxu0 %v551_v24 }
  0x17   :  { %322 = vmatpush.bf16.msra.mxu1 %v559_v25 }
  0x18   :  { %335 = vmatpush.bf16.msra.mxu2 %v567_v26 }
  0x19   :  { %348 = vmatpush.bf16.msra.mxu3 %v575_v27 }
  0x1a   :  { %310 = vmatpush.bf16.msra.mxu0 %v550_v28 }
  0x1b   :  { %323 = vmatpush.bf16.msra.mxu1 %v558_v29 }
  0x1c   :  { %336 = vmatpush.bf16.msra.mxu2 %v566_v30 }
  0x1d   :  { %349 = vmatpush.bf16.msra.mxu3 %v574_v31 }
  0x1e   :  { %311 = vmatpush.bf16.msra.mxu0 %v549_v32 }
  0x1f   :  { %324 = vmatpush.bf16.msra.mxu1 %v557_v33 }
  0x20   :  { %337 = vmatpush.bf16.msra.mxu2 %v565_v34 }
  0x21   :  { %350 = vmatpush.bf16.msra.mxu3 %v573_v35  ;;  %312 = vmatmul.bf16.vlgmr.msra.gmra.mxu0 %v104_v37 }
  0x22   :  { %381 = vmatpush.msrb.mxu0 %v360_v36  ;;  %325 = vmatmul.bf16.vlgmr.msra.gmra.mxu1 %v105_v38 }
  0x23   :  { %338 = vmatmul.bf16.vlgmr.msra.gmra.mxu2 %v106_v39 }
  0x24   :  { %351 = vmatmul.bf16.vlgmr.msra.gmra.mxu3 %v107_v40  ;;  %382 = vmatpush.msrb.mxu0 %v359_v41 }
  0x26   :  { %383 = vmatpush.msrb.mxu0 %v358_v42 }
  0x28   :  { %384 = vmatpush.msrb.mxu0 %v357_v43 }
  0x9e   :  { %v313_v45 = vpop.f32.mrf.mxu0 }
  0x9f   :  { %v326_v46 = vpop.f32.mrf.mxu1  ;;  %v314_v47 = vadd.f32 %v584_v44, %v313_v45 }
  0xa1   :  { %v327_v48 = vadd.f32 %v326_v46, %v314_v47 }
  0xa6   :  { %v339_v49 = vpop.f32.mrf.mxu2  ;;  %v315_v52 = vpop.f32.mrf.mxu0 }
  0xa7   :  { %v352_v50 = vpop.f32.mrf.mxu3  ;;  %v340_v51 = vadd.f32 %v339_v49, %v327_v48  ;;  %v328_v53 = vpop.f32.mrf.mxu1 }
  0xa9   :  { %v353_v54 = vadd.f32 %v352_v50, %v340_v51 }
  0xab   :  { %v356_v55 = vmax.f32 %v353_v54, 0.0 }
  0xad   :  { %548 = vmatmul.msk.f32.vlgmr.msrb.gmra.mxu0 %vm365_vm0, %v356_v55 }
  0xae   :  { %v341_v56 = vpop.f32.mrf.mxu2 }
  0xaf   :  { %v354_v57 = vpop.f32.mrf.mxu3 }
 0x12a   :  { %v386_v59 = vpop.f32.mrf.mxu0 }
 0x12b   :  { %v387_v60 = vadd.f32 %v585_v58, %v386_v59 }
 0x12d   :  { %v390_v61 = vsel %vm389_vm1, %v387_v60, -inf }
 0x12e   :  { %391 = vmax.xlane.f32.xlu0 %v390_v61 }
 0x1a1   :  { %v392_v62 = vpop.xlane.xlu0 %391 }
 0x1a2   :  { %v393_v63 = vsub.f32 %v387_v60, %v392_v62 }
 0x1a4   :  { %v394_v0 = vmul.f32 1.442695, %v393_v63 }
 0x1a6   :  { %586 = vpow2.f32 %v394_v0 }
 0x1ac   :  { %v587_v1 = vpop.eup %586 }
 0x1ad   :  { %v396_v2 = vsel %vm389_vm1, %v587_v1, 0.0 }
 0x1ae   :  { %397 = vadd.xlane.f32.xlu0 %v396_v2 }
 0x221   :  { %v398_v3 = vpop.xlane.xlu0 %397 }
 0x222   :  { %588 = vrcp.f32 %v398_v3 }
 0x228   :  { %v589_v4 = vpop.eup %588 }
 0x229   :  { %v400_v5 = vmul.f32 %v589_v4, %v587_v1 }
 0x22b   :  { %401 = vst.msk [vmem:[#allocation2] sm:$0xff] %vm389_vm1, %v400_v5 }
 0x22c   :  { %405 = vsyncadd [#allocation3], 96  ;;  %s408_s23 = sshll.u32 %s783_s5, 4  ;;  %s616_s24 = smov [#allocation2]   ;;  %s409_s23 = int_to_ptr.hbm [resolvable:$true] %s408_s23 }
 0x22d   :  { %s406_s25 = sshll.u32 %s616_s24, 4  ;;  %s617_s26 = smov 32   ;;  %s407_s25 = int_to_ptr.vmem [resolvable:$true] %s406_s25 }
 0x22e   :  { %s618_s27 = smov 2  }
 0x22f   :  { %414 = dma.vmem_to_hbm [thread:$0]  %s407_s25, 32, %s409_s23, [#allocation3], %s617_s26, %s617_s26, %s618_s27  }
 0x230   :  { %614 = dma.done.wait [#allocation3], 128  }
 0x231   :  { %615 = vsyncadd [#allocation3], 4294967168 }
 0x232   :  { %419 = vsyncpa [#allocation3], 1 }

</bundles_post_ra>
